<compile_context>
chip_gen: v6e
topology: v6e:2x2x1
jax: 0.10.0
libtpu: 0.0.40
codegen_flags: <defaults>
</compile_context>

<pallas_src>
import functools

import jax
import jax.numpy as jnp
from jax import lax
from jax.experimental import pallas as pl
from jax.experimental.pallas import tpu as pltpu

SEQ_LEN = 9          # hard-coded in the module's forward
MAX_NORM = 1.0       # nn.Embedding(..., max_norm=True) -> max_norm == 1.0
RENORM_EPS = 1e-7    # PyTorch embedding_renorm_ epsilon


def _renormed_embedding(emb_weight, dtype):
    """PyTorch nn.Embedding(max_norm=1.0) row renorm, done once in the wrapper."""
    ew = emb_weight.astype(jnp.float32)
    norm = jnp.sqrt(jnp.sum(ew * ew, axis=-1, keepdims=True))
    scale = jnp.where(norm > MAX_NORM, MAX_NORM / (norm + RENORM_EPS), 1.0)
    # TODO(synk): PyTorch also mutates the embedding weight tensor in place during forward;
    # forward outputs match, but that in-place side effect is not replicated.
    return (ew * scale).astype(dtype)


def _add_kernel(x_ref, emb_ref, o_ref):
    # x_ref: (TB, F)   emb_ref: (1, F)  (resident, pre-renormed, pre-tiled)   o_ref: (TB, F)
    o_ref[...] = x_ref[...] + emb_ref[...]


def _mix32(x):
    # splitmix32 / lowbias32-style avalanche on uint32 lanes (pure VPU work, portable).
    x = x ^ (x >> 16)
    x = x * jnp.uint32(0x7FEB352D)
    x = x ^ (x >> 15)
    x = x * jnp.uint32(0x846CA68B)
    x = x ^ (x >> 16)
    return x


def _add_dropout_kernel(x_ref, emb_ref, seed_ref, o_ref, *,
                        block_rows, row_width, threshold_u32, inv_keep):
    y = x_ref[...] + emb_ref[...]                              # (TB, F)

    # Counter-based PRNG: unique per-element counter hashed with the seed.
    rows = lax.broadcasted_iota(jnp.int32, y.shape, 0).astype(jnp.uint32)
    cols = lax.broadcasted_iota(jnp.int32, y.shape, 1).astype(jnp.uint32)
    row_off = (pl.program_id(0) * block_rows).astype(jnp.uint32)
    seed_u = seed_ref[0].astype(jnp.uint32)

    idx = (rows + row_off) * jnp.uint32(row_width % (1 << 32)) + cols
    bits = _mix32(idx + (seed_u + jnp.uint32(1)) * jnp.uint32(0x9E3779B9))
    bits = _mix32(bits ^ (seed_u * jnp.uint32(0x85EBCA77)))

    # bits ~ uniform uint32, so P(bits < threshold) == p.
    keep = bits >= jnp.uint32(threshold_u32)
    o_ref[...] = jnp.where(keep, y * jnp.asarray(inv_keep, y.dtype),
                           jnp.zeros((), y.dtype)).astype(o_ref.dtype)


def _choose_block_rows(batch, row_bytes, block_rows):
    if block_rows is None:
        # ~2 MiB per block; cap at 256 rows so double-buffered in+out blocks fit even
        # v5e's 16 MiB default scoped VMEM (raise vmem_limit_bytes to go bigger on v6e).
        tb = max(8, min(256, (2 << 20) // max(row_bytes, 1)))
    else:
        tb = max(1, int(block_rows))
    if tb >= batch:
        return batch                       # single full-extent block (always legal)
    return max(8, (tb // 8) * 8)           # sublane-aligned tiles when batch is split


def learned_bb3d_encoding(x, emb_weight, *, p=0.1, training=False, seed=0,
                          block_rows=None, min_pallas_bytes=1 << 20,
                          vmem_limit_bytes=None):
    """x: (B, S, N, D);  emb_weight: (S, D).  Returns dropout(x + emb[None, :, None, :])."""
    B, S, N, D = x.shape
    assert S == SEQ_LEN and emb_weight.shape == (S, D)
    F = S * N * D

    emb_r = _renormed_embedding(emb_weight, x.dtype)            # (S, D)

    use_dropout = training and p > 0.0
    if use_dropout and p >= 1.0:
        return jnp.zeros_like(x)                                # dropout(p=1) zeroes everything

    # Tiny inputs: launch + pipeline overhead dominates; let XLA fuse the elementwise ops.
    total_bytes = B * F * x.dtype.itemsize
    if total_bytes < min_pallas_bytes:
        y = x + emb_r[None, :, None, :]
        if use_dropout:
            keep = jax.random.bernoulli(jax.random.PRNGKey(seed), 1.0 - p, y.shape)
            y = jnp.where(keep, y / (1.0 - p), 0.0)
        return y.astype(x.dtype)

    # Lane-dense, sublane-friendly 2D layout: batch rows on sublanes, S*N*D on lanes.
    emb_flat = jnp.tile(emb_r, (1, N)).reshape(1, F)            # (1, S*N*D)
    x2 = x.reshape(B, F)

    TB = _choose_block_rows(B, F * x.dtype.itemsize, block_rows)
    n_blocks = pl.cdiv(B, TB)
    B_pad = n_blocks * TB
    if B_pad != B:
        x2 = jnp.pad(x2, ((0, B_pad - B), (0, 0)))

    x_spec = pl.BlockSpec((TB, F), lambda b: (b, 0))
    emb_spec = pl.BlockSpec((1, F), lambda b: (0, 0))           # constant map: DMA'd once, resident
    out_spec = pl.BlockSpec((TB, F), lambda b: (b, 0))
    out_shape = jax.ShapeDtypeStruct((B_pad, F), x.dtype)
    cparams = pltpu.CompilerParams(dimension_semantics=("parallel",),
                                   vmem_limit_bytes=vmem_limit_bytes)

    if not use_dropout:
        out2 = pl.pallas_call(
            _add_kernel,
            out_shape=out_shape,
            grid_spec=pl.GridSpec(grid=(n_blocks,),
                                  in_specs=[x_spec, emb_spec],
                                  out_specs=out_spec),
            compiler_params=cparams,
        )(x2, emb_flat)
    else:
        threshold_u32 = min(max(int(round(p * (1 << 32))), 0), (1 << 32) - 1)
        inv_keep = 1.0 / (1.0 - p)
        seed_arr = jnp.asarray([seed], dtype=jnp.int32)
        kernel = functools.partial(_add_dropout_kernel,
                                   block_rows=TB, row_width=F,
                                   threshold_u32=threshold_u32, inv_keep=inv_keep)
        out2 = pl.pallas_call(
            kernel,
            out_shape=out_shape,
            grid_spec=pl.GridSpec(
                grid=(n_blocks,),
                in_specs=[x_spec, emb_spec,
                          pl.BlockSpec(memory_space=pltpu.MemorySpace.SMEM)],
                out_specs=out_spec),
            compiler_params=cparams,
        )(x2, emb_flat, seed_arr)

    if B_pad != B:
        out2 = out2[:B]
    return out2.reshape(B, S, N, D)


if __name__ == "__main__":
    key = jax.random.PRNGKey(0)
    k_x, k_w = jax.random.split(key)

    B, S, N, D = 2, SEQ_LEN, 8, 32        # batch=2, seq=9, agents/keypoints=8, d_model=32
    x = jax.random.normal(k_x, (B, S, N, D), dtype=jnp.float32)
    emb_weight = jax.random.normal(k_w, (S, D), dtype=jnp.float32)

    # Pure-JAX reference (PyTorch max_norm renorm + broadcast add).
    norms = jnp.linalg.norm(emb_weight, axis=-1, keepdims=True)
    scale = jnp.where(norms > MAX_NORM, MAX_NORM / (norms + RENORM_EPS), 1.0)
    ref = x + (emb_weight * scale)[None, :, None, :]

    # Eval mode through the Pallas kernel (force past the tiny-input fallback).
    out = learned_bb3d_encoding(x, emb_weight, training=False, min_pallas_bytes=0)
    jax.block_until_ready(out)
    assert jnp.allclose(out, ref, atol=1e-5, rtol=1e-5)

    # Multi-block path: batch split across grid steps, non-divisible batch -> tail padding.
    B2 = 20
    x_big = jax.random.normal(jax.random.PRNGKey(1), (B2, S, N, D), dtype=jnp.float32)
    ref_big = x_big + (emb_weight * scale)[None, :, None, :]
    out_big = learned_bb3d_encoding(x_big, emb_weight, training=False,
                                    min_pallas_bytes=0, block_rows=8)
    jax.block_until_ready(out_big)
    assert jnp.allclose(out_big, ref_big, atol=1e-5, rtol=1e-5)

    # Training mode: every element must be either 0 or ref / (1 - p); keep rate ~ 1 - p.
    p = 0.1
    out_tr = learned_bb3d_encoding(x_big, emb_weight, p=p, training=True, seed=123,
                                   min_pallas_bytes=0, block_rows=8)
    jax.block_until_ready(out_tr)
    scaled = ref_big / (1.0 - p)
    is_zero = jnp.abs(out_tr) < 1e-6
    is_scaled = jnp.abs(out_tr - scaled) < 1e-4
    assert bool(jnp.all(is_zero | is_scaled))
    kept_frac = float(jnp.mean(~is_zero))
    assert 0.75 < kept_frac < 0.99, kept_frac

    print("KERNEL_OK")
</pallas_src>

<mosaic_0001>
module attributes {stable_mosaic.version = 11 : i64} {
  func.func @_add_kernel(%arg0: i32, %arg1: memref<2x2304xf32, #tpu.memory_space<vmem>>, %arg2: memref<1x2304xf32, #tpu.memory_space<vmem>>, %arg3: memref<2x2304xf32, #tpu.memory_space<vmem>>) attributes {dimension_semantics = [#tpu.dimension_semantics<parallel>], iteration_bounds = array<i64: 1>, scalar_prefetch = 0 : i64, scratch_operands = 0 : i64, tpu.core_type = #tpu.core_type<tc>, window_params = [{transform_indices = @transform_0, window_bounds = array<i64: 2, 2304>}, {pipeline_mode = #tpu.pipeline_mode<synchronous>, transform_indices = @transform_1, window_bounds = array<i64: 1, 2304>}, {transform_indices = @transform_2, window_bounds = array<i64: 2, 2304>}]} {
    %c0 = arith.constant 0 : index
    %c0_0 = arith.constant 0 : index
    %0 = vector.load %arg1[%c0, %c0_0] : memref<2x2304xf32, #tpu.memory_space<vmem>>, vector<2x2304xf32>
    %c0_1 = arith.constant 0 : index
    %c0_2 = arith.constant 0 : index
    %1 = vector.load %arg2[%c0_1, %c0_2] : memref<1x2304xf32, #tpu.memory_space<vmem>>, vector<1x2304xf32>
    %2 = vector.broadcast %1 : vector<1x2304xf32> to vector<2x2304xf32>
    %3 = arith.addf %0, %2 : vector<2x2304xf32>
    %c0_3 = arith.constant 0 : index
    %c0_4 = arith.constant 0 : index
    %4 = vector.load %arg3[%c0_3, %c0_4] : memref<2x2304xf32, #tpu.memory_space<vmem>>, vector<2x2304xf32>
    tpu.vector_store %arg3[%c0_3, %c0_4], %3 {strides = array<i32>} : memref<2x2304xf32, #tpu.memory_space<vmem>>, vector<2x2304xf32>,
    return
  }
  func.func @transform_0(%arg0: i32) -> (i32, i32) {
    %c0_i32 = arith.constant 0 : i32
    %c0_i32_0 = arith.constant 0 : i32
    return %arg0, %c0_i32 : i32, i32
  }
  func.func @transform_1(%arg0: i32) -> (i32, i32) {
    %c0_i32 = arith.constant 0 : i32
    %c0_i32_0 = arith.constant 0 : i32
    %c0_i32_1 = arith.constant 0 : i32
    return %c0_i32, %c0_i32_0 : i32, i32
  }
  func.func @transform_2(%arg0: i32) -> (i32, i32) {
    %c0_i32 = arith.constant 0 : i32
    %c0_i32_0 = arith.constant 0 : i32
    return %arg0, %c0_i32 : i32, i32
  }
}

</mosaic_0001>

<bundles_post_ra>
// kernel: tpu_custom_call.1
= control target key start
LH: loop header
LB: loop body
LE: loop exit
PB: predicated region body
PF: predicated region fallthrough
CT: control target
= control target key end

     0   :  { %7 = vsyncpa [#allocation3], 0  ;;  %s324_s0 = inlined_call_operand.hbm [shape: f32[2,2304], index: 0, kind: input, shape index: {}]   ;;  %s325_s1 = inlined_call_operand.hbm [shape: f32[1,2304], index: 1, kind: input, shape index: {}]   ;;  %s326_s2 = inlined_call_operand.hbm [shape: f32[2,2304], index: 2, kind: output, shape index: {}]  }
   0x1   :  { %8 = vsyncpa [#allocation6], 0 }
   0x2   :  { %9 = vsyncpa [#allocation4], 0  ;;  %s296_s9 = smov [#allocation2]   ;;  %s297_s11 = smov [#allocation5]  }
   0x3   :  { %s16_s10 = sshll.u32 %s296_s9, 4  ;;  %s26_s12 = sshll.u32 %s297_s11, 4  ;;  %s17_s10 = int_to_ptr.vmem [resolvable:$true] %s16_s10  ;;  %s27_s12 = int_to_ptr.vmem [resolvable:$true] %s26_s12 }
   0x4   :  { %s238_s13 = scalar_lea.vmem %s17_s10, 576  ;;  %p243_p1 = scmp.lt.s32.totalorder %s17_s10, %s17_s10 }
   0x5   :  { %p239_p0 = scmp.ne.s32.totalorder %s17_s10, %s238_s13  ;;  %p244_p2 = scmp.lt.s32.totalorder %s238_s13, %s238_s13 }
   0x7   :  { %p245_p3 = por %p244_p2, %p243_p1 }
   0x9   :  { %p246_p4 = pnand %p245_p3, %p239_p0 }
   0xb   :  { %249 = shalt.err (!%p246_p4)
}
   0xc   :  { %19 = dma.hbm_to_vmem [thread:$0]  %s324_s0, 576, %s17_s10, [#allocation3]  }
   0xd   :  { %s258_s16 = scalar_lea.vmem %s27_s12, 288  ;;  %p263_p6 = scmp.lt.s32.totalorder %s27_s12, %s27_s12 }
   0xe   :  { %p259_p5 = scmp.ne.s32.totalorder %s27_s12, %s258_s16  ;;  %p264_p7 = scmp.lt.s32.totalorder %s258_s16, %s258_s16 }
  0x10   :  { %p265_p8 = por %p264_p7, %p263_p6 }
  0x12   :  { %p266_p9 = pnand %p265_p8, %p259_p5 }
  0x14   :  { %269 = shalt.err (!%p266_p9)
}
  0x15   :  { %29 = dma.hbm_to_vmem [thread:$0]  %s325_s1, 288, %s27_s12, [#allocation6]  }
  0x16   :  { %290 = dma.done.wait [#allocation3], 576  }
  0x17   :  { %291 = vsyncadd [#allocation3], 4294966720 }
  0x18   :  { %292 = dma.done.wait [#allocation6], 288  }
  0x19   :  { %293 = vsyncadd [#allocation6], 4294967008  ;;  %v47_v0 = vlaneseq  ;;  %v298_v1 = vmov 1983009808   ;;  %v41_v13 = vld [vmem:[#allocation5] sm:$0xff]  ;;  %v42_v19 = vld [vmem:[#allocation5 + $0x8] sm:$0xff] }
  0x1a   :  { %v122_v2 = vunpack.c.l.s4 %v298_v1  ;;  %v43_v36 = vld [vmem:[#allocation5 + $0x10] sm:$0x3]  ;;  %v36_v37 = vld [vmem:[#allocation2] sm:$0xff]  ;;  %v37_v43 = vld [vmem:[#allocation2 + $0x8] sm:$0xff]  ;;  %s299_s0 = smov [#allocation7]  }
  0x1b   :  { %v48_v3 = vshrl.u32 %v47_v0, 7  ;;  %v38_v52 = vld [vmem:[#allocation2 + $0x10] sm:$0xff]  ;;  %v39_v61 = vld [vmem:[#allocation2 + $0x18] sm:$0xff]  ;;  %v40_v62 = vld [vmem:[#allocation2 + $0x20] sm:$0xf]  ;;  %s216_s1 = sshll.u32 %s299_s0, 4  ;;  %s217_s1 = int_to_ptr.vmem [resolvable:$true] %s216_s1 }
  0x1c   :  { %v123_v4 = vunpack.c.0.s8 %v122_v2  ;;  %s270_s19 = scalar_lea.vmem %s217_s1, 576  ;;  %p275_p11 = scmp.lt.s32.totalorder %s217_s1, %s217_s1 }
  0x1d   :  { %v49_v5 = vsub.s32 0, %v48_v3  ;;  %v53_v6 = vsub.s32 1, %v48_v3  ;;  %v57_v7 = vsub.s32 2, %v48_v3  ;;  %v61_v8 = vsub.s32 3, %v48_v3  ;;  %p271_p10 = scmp.ne.s32.totalorder %s217_s1, %s270_s19  ;;  %p276_p12 = scmp.lt.s32.totalorder %s270_s19, %s270_s19 }
  0x1e   :  { %v65_v9 = vsub.s32 4, %v48_v3  ;;  %v69_v10 = vsub.s32 5, %v48_v3  ;;  %v73_v11 = vsub.s32 6, %v48_v3  ;;  %v77_v12 = vsub.s32 7, %v48_v3 }
  0x1f   :  { %v126_v14 = vsub.s32 %v123_v4, %v48_v3  ;;  %v50_v15 = vrot.slane %v41_v13, %v49_v5  ;;  %v54_v16 = vrot.slane %v41_v13, %v53_v6  ;;  %v58_v17 = vrot.slane %v41_v13, %v57_v7  ;;  %p277_p13 = por %p276_p12, %p275_p11 }
  0x20   :  { %v62_v18 = vrot.slane %v41_v13, %v61_v8  ;;  %v66_v20 = vrot.slane %v41_v13, %v65_v9  ;;  %v70_v21 = vrot.slane %v41_v13, %v69_v10  ;;  %v74_v22 = vrot.slane %v41_v13, %v73_v11 }
  0x21   :  { %v78_v23 = vrot.slane %v41_v13, %v77_v12  ;;  %v119_v24 = vcombine.low %v50_v15, %v54_v16  ;;  %v82_v26 = vrot.slane %v42_v19, %v49_v5  ;;  %v86_v27 = vrot.slane %v42_v19, %v53_v6  ;;  %p278_p0 = pnand %p277_p13, %p271_p10 }
  0x22   :  { %v120_v25 = vcombine.low %v58_v17, %v62_v18  ;;  %v136_v28 = vcombine.low %v66_v20, %v70_v21  ;;  %v90_v30 = vrot.slane %v42_v19, %v57_v7  ;;  %v94_v31 = vrot.slane %v42_v19, %v61_v8 }
  0x23   :  { %v137_v29 = vcombine.low %v74_v22, %v78_v23  ;;  %v127_v32 = vrot.slane %v119_v24, %v126_v14  ;;  %v153_v34 = vcombine.low %v82_v26, %v86_v27  ;;  %v98_v35 = vrot.slane %v42_v19, %v65_v9 }
  0x24   :  { %v134_v33 = vrot.slane %v120_v25, %v126_v14  ;;  %v144_v38 = vrot.slane %v136_v28, %v126_v14  ;;  %v154_v40 = vcombine.low %v90_v30, %v94_v31  ;;  %v102_v41 = vrot.slane %v42_v19, %v69_v10 }
  0x25   :  { %v151_v39 = vrot.slane %v137_v29, %v126_v14  ;;  %v161_v44 = vrot.slane %v153_v34, %v126_v14  ;;  %v106_v45 = vrot.slane %v42_v19, %v73_v11  ;;  %v110_v46 = vrot.slane %v42_v19, %v77_v12 }
  0x26   :  { %v135_v42 = vcombine.low %v127_v32, %v134_v33  ;;  %v168_v48 = vrot.slane %v154_v40, %v126_v14  ;;  %v170_v49 = vcombine.low %v98_v35, %v102_v41  ;;  %v114_v50 = vrot.slane %v43_v36, %v49_v5 }
  0x27   :  { %v152_v47 = vcombine.low %v144_v38, %v151_v39  ;;  %v171_v53 = vcombine.low %v106_v45, %v110_v46  ;;  %v118_v54 = vrot.slane %v43_v36, %v53_v6 }
  0x28   :  { %v200_v51 = vadd.f32 %v135_v42, %v36_v37  ;;  %v169_v56 = vcombine.low %v161_v44, %v168_v48  ;;  %v178_v57 = vrot.slane %v170_v49, %v126_v14 }
  0x29   :  { %v201_v55 = vadd.f32 %v152_v47, %v37_v43  ;;  %v185_v58 = vrot.slane %v171_v53, %v126_v14  ;;  %v187_v59 = vcombine.low %v114_v50, %v118_v54 }
  0x2a   :  { %205 = vst [vmem:[#allocation7] sm:$0xff] %v200_v51  ;;  %v202_v60 = vadd.f32 %v169_v56, %v38_v52 }
  0x2b   :  { %206 = vst [vmem:[#allocation7 + $0x8] sm:$0xff] %v201_v55  ;;  %v186_v63 = vcombine.low %v178_v57, %v185_v58  ;;  %v194_v0 = vrot.slane %v187_v59, %v126_v14 }
  0x2c   :  { %207 = vst [vmem:[#allocation7 + $0x10] sm:$0xff] %v202_v60 }
  0x2d   :  { %v203_v1 = vadd.f32 %v186_v63, %v39_v61  ;;  %v204_v2 = vadd.f32 %v194_v0, %v40_v62 }
  0x2f   :  { %208 = vst [vmem:[#allocation7 + $0x18] sm:$0xff] %v203_v1  ;;  %209 = vst [vmem:[#allocation7 + $0x20] sm:$0xf] %v204_v2 }
  0x30   :  { %281 = shalt.err (!%p278_p0)
}
  0x31   :  { %219 = dma.vmem_to_hbm [thread:$0]  %s217_s1, 576, %s326_s2, [#allocation4]  }
  0x32   :  { %294 = dma.done.wait [#allocation4], 576  }
  0x33   :  { %295 = vsyncadd [#allocation4], 4294966720 }
  0x34   :  { %223 = vsyncpa [#allocation3], 1 }
  0x35   :  { %224 = vsyncpa [#allocation6], 1 }
  0x36   :  { %225 = vsyncpa [#allocation4], 1 }

</bundles_post_ra>
